<compile_context>
chip_gen: v7x
topology: tpu7x:2x2x1
jax: 0.10.0
libtpu: 0.0.40
codegen_flags: <defaults>
</compile_context>

<pallas_src>
import math

import jax
import jax.numpy as jnp
from jax.experimental import pallas as pl
from jax.experimental.pallas import tpu as pltpu


# ----------------------------------------------------------------------------
# PE table (the registered buffer built in __init__)
# ----------------------------------------------------------------------------
def _build_pe_table(embed_dim, max_len=100, dtype=jnp.float32):
    # PyTorch's 0::2 / 1::2 assignment assumes an even embed_dim.
    # NOTE: pass dtype=jnp.bfloat16 here if the downstream consumer is bf16 --
    # the kernel is HBM-write-bound, so halving output bytes ~halves wall time.
    assert embed_dim % 2 == 0, "PositionalEncoding requires an even embed_dim"
    position = jnp.arange(max_len, dtype=jnp.float32)[:, None]          # (L, 1)
    div_term = jnp.exp(jnp.arange(0, embed_dim, 2, dtype=jnp.float32)
                       * (-math.log(10000.0) / embed_dim))              # (D/2,)
    pe = jnp.zeros((max_len, embed_dim), jnp.float32)
    pe = pe.at[:, 0::2].set(jnp.sin(position * div_term))
    pe = pe.at[:, 1::2].set(jnp.cos(position * div_term))
    return pe.astype(dtype)


# ----------------------------------------------------------------------------
# Pallas kernel: pure copy of the pre-tiled PE slab into a lane-dense block
# ----------------------------------------------------------------------------
def _pe_copy_kernel(pe_ref, o_ref):
    # pe_ref : (T, bn*D)     VMEM-resident pre-tiled PE slab (same block every step)
    # o_ref  : (1, T, bn*D)  lane-dense output block for (batch b, node-tile n)
    o_ref[...] = pe_ref[...][None]


def _pick_node_tile(T, N, D, elem_size, vmem_budget_bytes=12 << 20):
    """Node tile so that bn*D is a multiple of 128 (or bn == N), within VMEM.

    Budget accounts for double-buffering of both the output block and the
    (conservatively also double-buffered) input slab: total ~= 4 * block bytes.
    12 MiB total keeps us inside the scoped-VMEM default on every generation
    (v5e 16 MiB, v6e/v7x 32 MiB) while blocks stay >= ~1 MiB whenever N allows,
    which already reaches ~85% of the HBM roofline.
    """
    per_block_budget = max(vmem_budget_bytes // 4, 1)
    row_bytes = max(T * D * elem_size, 1)
    if N * row_bytes <= per_block_budget:
        return N                               # full extent -> one block per batch
    # Lane-dense tiling: bn*D must be a multiple of 128.
    g = (128 * D // math.gcd(128, D)) // D     # = lcm(D, 128) // D
    bn = max((per_block_budget // row_bytes) // g, 1) * g
    return min(bn, N)


def positional_encoding_forward(x, pe_table, node_tile=None):
    """forward(x): returns pe[:T] broadcast to (B, T, N, D)."""
    B, T, N = x.shape[0], x.shape[1], x.shape[2]
    D = pe_table.shape[-1]
    assert T <= pe_table.shape[0], "sequence length exceeds max_len"
    dtype = pe_table.dtype
    elem = jnp.dtype(dtype).itemsize

    pe_t = jax.lax.slice(pe_table, (0, 0), (T, D))       # pe[:T, :]

    bn = node_tile if node_tile is not None else _pick_node_tile(T, N, D, elem)
    bn = min(bn, N)
    if bn < N:
        # Lane-dense layout requirement for partial node tiles.
        assert (bn * D) % 128 == 0, "node tile * embed_dim must be a multiple of 128"

    # Pre-tile the PE rows across the node tile once, in plain JAX, so the
    # kernel body is a straight vld/vst copy (no in-kernel lane replication).
    pe_tiled = jnp.tile(pe_t, (1, bn))                   # (T, bn*D)

    grid = (B, pl.cdiv(N, bn))

    out_flat = pl.pallas_call(
        _pe_copy_kernel,
        out_shape=jax.ShapeDtypeStruct((B, T, N * D), dtype),
        grid=grid,
        in_specs=[pl.BlockSpec((T, bn * D), lambda b, n: (0, 0))],
        out_specs=pl.BlockSpec((1, T, bn * D), lambda b, n: (b, 0, n)),
        compiler_params=pltpu.CompilerParams(
            dimension_semantics=("parallel", "parallel")),
    )(pe_tiled)

    # Contiguous minor-dim reshape back to (B, T, N, D) is free.
    return out_flat.reshape(B, T, N, D)


# ----------------------------------------------------------------------------
# Module-style wrapper (mirrors the nn.Module interface)
# ----------------------------------------------------------------------------
class PositionalEncoding:
    def __init__(self, embed_dim, max_len=100, dtype=jnp.float32):
        self.embed_dim = embed_dim
        self.max_len = max_len
        self.pe = _build_pe_table(embed_dim, max_len, dtype)   # registered buffer

    def __call__(self, x):
        return positional_encoding_forward(x, self.pe)


# ----------------------------------------------------------------------------
if __name__ == "__main__":
    key = jax.random.PRNGKey(0)

    # Small shapes consistent with MSTGRN's usage of PositionalEncoding:
    # x: (batch, seq_len, num_nodes, input_dim); embed_dim as in the model.
    B, T, N, C = 2, 12, 8, 2
    embed_dim = 12
    x = jax.random.normal(key, (B, T, N, C), jnp.float32)

    module = PositionalEncoding(embed_dim, max_len=100)

    # Case 1: full-node block path (grid = (B, 1)).
    out = jax.block_until_ready(module(x))
    assert out.shape == (B, T, N, embed_dim)
    ref = jnp.broadcast_to(module.pe[None, :T, None, :], (B, T, N, embed_dim))
    assert jnp.allclose(out, ref, rtol=0.0, atol=0.0)

    # Case 2: exercise the lane-dense node-tiled path (bn*D multiple of 128),
    # including a ragged last node tile.
    N2 = 40
    x2 = jax.random.normal(key, (B, T, N2, C), jnp.float32)
    out2 = jax.block_until_ready(
        positional_encoding_forward(x2, module.pe, node_tile=32))
    assert out2.shape == (B, T, N2, embed_dim)
    ref2 = jnp.broadcast_to(module.pe[None, :T, None, :], (B, T, N2, embed_dim))
    assert jnp.allclose(out2, ref2, rtol=0.0, atol=0.0)

    print("KERNEL_OK")
</pallas_src>

<mosaic_0001>
module attributes {stable_mosaic.version = 11 : i64} {
  func.func @_pe_copy_kernel(%arg0: i32, %arg1: i32, %arg2: memref<12x96xf32, #tpu.memory_space<vmem>>, %arg3: memref<1x12x96xf32, #tpu.memory_space<vmem>>) attributes {dimension_semantics = [#tpu.dimension_semantics<parallel>, #tpu.dimension_semantics<parallel>], iteration_bounds = array<i64: 2, 1>, scalar_prefetch = 0 : i64, scratch_operands = 0 : i64, tpu.core_type = #tpu.core_type<tc>, window_params = [{pipeline_mode = #tpu.pipeline_mode<synchronous>, transform_indices = @transform_0, window_bounds = array<i64: 12, 96>}, {transform_indices = @transform_1, window_bounds = array<i64: 1, 12, 96>}]} {
    %c0 = arith.constant 0 : index
    %c0_0 = arith.constant 0 : index
    %0 = vector.load %arg2[%c0, %c0_0] : memref<12x96xf32, #tpu.memory_space<vmem>>, vector<12x96xf32>
    %1 = vector.shape_cast %0 : vector<12x96xf32> to vector<1x12x96xf32>
    %c0_1 = arith.constant 0 : index
    %c0_2 = arith.constant 0 : index
    %c0_3 = arith.constant 0 : index
    %2 = vector.load %arg3[%c0_1, %c0_2, %c0_3] : memref<1x12x96xf32, #tpu.memory_space<vmem>>, vector<1x12x96xf32>
    tpu.vector_store %arg3[%c0_1, %c0_2, %c0_3], %1 {strides = array<i32>} : memref<1x12x96xf32, #tpu.memory_space<vmem>>, vector<1x12x96xf32>,
    return
  }
  func.func @transform_0(%arg0: i32, %arg1: i32) -> (i32, i32) {
    %c0_i32 = arith.constant 0 : i32
    %c0_i32_0 = arith.constant 0 : i32
    %c0_i32_1 = arith.constant 0 : i32
    return %c0_i32, %c0_i32_0 : i32, i32
  }
  func.func @transform_1(%arg0: i32, %arg1: i32) -> (i32, i32, i32) {
    %c0_i32 = arith.constant 0 : i32
    %c0_i32_0 = arith.constant 0 : i32
    return %arg0, %c0_i32, %arg1 : i32, i32, i32
  }
}

</mosaic_0001>

<bundles_post_ra>
// kernel: tpu_custom_call.1
= control target key start
LH: loop header
LB: loop body
LE: loop exit
PB: predicated region body
PF: predicated region fallthrough
CT: control target
= control target key end

     0   :  { %6 = vsyncpa [#allocation3], 0  ;;  %s333_s6 = smov 0   ;;  %s335_s7 = smov 0   ;;  %s406_s0 = inlined_call_operand.hbm [shape: f32[12,96], index: 0, kind: input, shape index: {}]   ;;  %s407_s1 = inlined_call_operand.vmem [shape: f32[2,12,96], index: 1, kind: output, shape index: {}]  }
   0x1   :  { %s337_s8 = smov 0  }
   0x2 LB: > { %s216_s9 = sadd.s32 4294967295, %s318_s8   ;;  %s24_s10 = sadd.s32 1, %s314_s7  ;;  %s318_s8 = sphi %s337_s8, %s12_s8   ;;  %s314_s7 = sphi %s335_s7, %s417_s7   ;;  %s310_s6 = sphi %s333_s6, %s416_s6  }
   0x3   : > { %p26_p0 = scmp.ge.s32.totalorder %s24_s10, 2  ;;  %p218_p1 = scmp.ge.s32.totalorder %s318_s8, 1 }
   0x4   : > { %p78_p2 = scmp.lt.s32.totalorder %s318_s8, 3  ;;  %p358_p4 = scmp.eq.s32.totalorder %s216_s9, 0 }
   0x5   : > { %s419_s10 = smov (%p26_p0, %s24_s10), 0  ;;  %s320_s13 = smov [#allocation2]  }
   0x6   : > { %p354_p3 = pnand %p218_p1, %p78_p2  ;;  %s90_s14 = sshll.u32 %s320_s13, 4  ;;  %s91_s14 = int_to_ptr.vmem [resolvable:$true] %s90_s14 }
   0x7   : > { %s412_s12 = scalar_select %p358_p4, 1, 0 }
   0x8   : > { %s411_s11 = scalar_select %p354_p3, 1, 0 }
   0x9   : > { %p231_p5 = pneg %p354_p3  ;;  %s264_s18 = scalar_lea.hbm %s406_s0, 256 }
   0xa   : > { %p265_p7 = scmp.ne.s32.totalorder %s406_s0, %s264_s18  ;;  %p271_p11 = scmp.lt.u32.totalorder %s264_s18, %s406_s0 }
   0xb   : > { %p366_p6 = pnand %p358_p4, %p231_p5 }
   0xd   : > { %p266_p8 = pneg %p366_p6 }
   0xf   : > { %p267_p9 = pnand %p266_p8, %p265_p7 }
  0x11   : > { %p268_p10 = pneg %p267_p9 }
  0x13   : > { %p273_p12 = pnand %p271_p11, %p268_p10 }
  0x15   : > { %276 = shalt.err (!%p273_p12)
}
  0x16   : > { %s277_s23 = scalar_lea.vmem %s91_s14, 256  ;;  %p285_p2 = scmp.lt.s32.totalorder %s91_s14, %s91_s14 }
  0x17   : > { %p278_p13 = scmp.ne.s32.totalorder %s91_s14, %s277_s23  ;;  %p286_p5 = scmp.lt.s32.totalorder %s277_s23, %s277_s23 }
  0x19   : > { %p280_p0 = pnand %p278_p13, %p266_p8  ;;  %p287_p4 = por %p286_p5, %p285_p2 }
  0x1b   : > { %p281_p1 = pneg %p280_p0 }
  0x1d   : > { %p288_p3 = pnand %p287_p4, %p281_p1 }
  0x1f   : > { %291 = shalt.err (!%p288_p3)
}
  0x20   : > { %s321_s24 = smov 128   ;;  %s322_s25 = smov 8  }
  0x21   : > { %234 = dma.hbm_to_vmem [thread:$0]  (!%p366_p6), %s406_s0, 256, %s91_s14, [#allocation3], %s321_s24, %s321_s24, %s322_s25  }
  0x22   : > { %p414_p7 = scmp.ne.s32.totalorder %s411_s11, 0 }
  0x23   : > { %p415_p9 = scmp.ne.s32.totalorder (!%p414_p7), %s412_s12, 0 }
  0x24   : > { %106 = sbr.rel (%p414_p7) target bundleno = 51 (0x33), region = 24 }
  0x2b   : > { %305 = dma.done.wait (%p415_p9), [#allocation3], 256  }
  0x2c   : > { %307 = vsyncadd (%p415_p9), [#allocation3], 4294967040  ;;  %p124_p3 = scmp.lt.s32.totalorder %s310_s6, 1  ;;  %vm134_vm0 = vcmask 785408   ;;  %vm136_vm1 = vcmask 781312   ;;  %v132_v0 = vld [vmem:[#allocation2] sm:$0xff] }
  0x2d   : > { %v133_v1 = vld [vmem:[#allocation2 + $0x8] sm:$0xf] }
  0x2e   : > { %s421_s6 = smov (!%p124_p3, %s310_s6), 1 }
  0x2f   : > { %s226_s28 = sshll.u32 %s421_s6, 4 }
  0x30   : > { %s131_s2 = scalar_lea.vmem %s407_s1, %s226_s28 }
  0x31   : > { %135 = vst.msk [vmem:[%s131_s2] sm:$0xff] %vm134_vm0, %v132_v0 }
  0x32   : > { %137 = vst.msk [vmem:[%s131_s2 + $0x8] sm:$0xf] %vm136_vm1, %v133_v1 }
  0x33 PF: > { %s12_s8 = sadd.s32 1, %s318_s8   ;;  %s416_s6 = smov %s314_s7 }
  0x34   : > { %p9_p4 = scmp.ge.s32.totalorder %s12_s8, 4   ;;  %s417_s7 = smov %s419_s10 }
  0x36   :  { %11 = sbr.rel (!%p9_p4) target bundleno = 2 (0x2), region = 56 }
  0x3d   :  { %165 = vsyncpa [#allocation3], 1 }
  0x3e   :  { %167 = vsyncpa [#allocation3 + $0x1], 1 }

</bundles_post_ra>
